<compile_context>
chip_gen: v7x
topology: tpu7x:2x2x1
jax: 0.10.0
libtpu: 0.0.40
codegen_flags: <defaults>
</compile_context>

<pallas_src>
from functools import partial

import jax
import jax.numpy as jnp
from jax.experimental import pallas as pl
from jax.experimental.pallas import tpu as pltpu

_WIDTH_CANDIDATES = (1024, 512, 256, 128)  # lane-dense last dims (multiples of 128)
_ROW_ALIGN = 32                            # int8 native (32, 128) vreg tile
_MAX_TR = 4096                             # 4096 rows x 1024 B = 4 MiB per block
_MIN_KERNEL_ELEMS = 128 * 1024             # below this, pure jnp beats kernel launch


def _iand_or_kernel(b_ref, o_ref):
    # logical_or(a & b, b) == b by absorption, so the op reduces to a streaming
    # copy of b; the `a` stream is never DMA'd (perf review).
    o_ref[...] = b_ref[...]


def _round_up(x: int, m: int) -> int:
    return ((x + m - 1) // m) * m


def _iand_or_pallas(b: jax.Array) -> jax.Array:
    """Streams `b` through the Pallas kernel; returns bool array of b's shape."""
    orig_shape = b.shape
    n = b.size

    # --- slab geometry (all static under jit) -------------------------------
    width = next((w for w in _WIDTH_CANDIDATES if n % w == 0), None)
    if width is None:          # ragged: pad flat length up to a 1024 multiple
        width = _WIDTH_CANDIDATES[0]
        n_pad = _round_up(n, width)
    else:                      # fast path: reshape only, no padding pass
        n_pad = n
    rows = n_pad // width

    # bool-first cast keeps semantics correct for any integer dtype, then int8
    # for a lane-dense slab the TPU handles natively.  With allow_input_fusion
    # this cast/reshape fuses into the pallas operand (no extra HBM pass).
    b_flat = b.astype(jnp.bool_).astype(jnp.int8).reshape(-1)
    if n_pad != n:
        b_flat = jnp.pad(b_flat, (0, n_pad - n))
    b2 = b_flat.reshape(rows, width)

    # --- tile rows: big blocks, but >= 2 tiles when possible (v7x megacore) ---
    if rows <= 2 * _ROW_ALIGN:
        tr = rows                                   # single block == full dims
    else:
        tr = min(_MAX_TR, _round_up(pl.cdiv(rows, 2), _ROW_ALIGN))
    grid = (pl.cdiv(rows, tr),)

    out2 = pl.pallas_call(
        _iand_or_kernel,
        out_shape=jax.ShapeDtypeStruct((rows, width), jnp.int8),
        grid_spec=pl.GridSpec(
            grid=grid,
            in_specs=[pl.BlockSpec((tr, width), lambda i: (i, 0))],
            out_specs=pl.BlockSpec((tr, width), lambda i: (i, 0)),
        ),
        compiler_params=pltpu.CompilerParams(
            dimension_semantics=("parallel",),        # 2-TC sharding on v7x
            vmem_limit_bytes=32 * 1024 * 1024,        # safe on v5e/v6e/v7x
            allow_input_fusion=[True],                # fuse cast/reshape into operand
        ),
    )(b2)

    out = out2.reshape(-1)
    if n_pad != n:
        out = out[:n]
    return out.reshape(orig_shape).astype(jnp.bool_)


@partial(jax.jit, static_argnames=("force_kernel",))
def simple_iand_module(a: jax.Array, b: jax.Array, force_kernel: bool = False) -> jax.Array:
    """Pallas implementation of SimpleIandModule.forward (equal-shaped inputs)."""
    assert a.shape == b.shape, "test module uses equal-shaped inputs"
    # TODO(synk): PyTorch mutates `a` in place (a &= b); JAX is functional, so the
    # caller's `a` is untouched — only the returned value is produced.
    if force_kernel or b.size >= _MIN_KERNEL_ELEMS:
        # logical_or(a & b, b) == (b != 0): `a` is dead, don't stream it.
        return _iand_or_pallas(b)
    # Small-input fallback: launch + pipeline overhead would dominate.
    return jnp.logical_or(jnp.logical_and(a, b), b)


if __name__ == "__main__":
    key = jax.random.PRNGKey(0)
    k1, k2 = jax.random.split(key)

    shape = (2, 4, 16, 16)  # small NCHW bool tensors, as in the glow test
    a = jax.random.bernoulli(k1, p=0.5, shape=shape)
    b = jax.random.bernoulli(k2, p=0.5, shape=shape)

    # Force the Pallas kernel path (small shapes would otherwise take the
    # jnp fallback), and also run the default wrapper path.
    out = jax.block_until_ready(simple_iand_module(a, b, force_kernel=True))
    out_default = jax.block_until_ready(simple_iand_module(a, b))

    # Reference: logical_or(a & b, b).
    ref = jnp.logical_or(jnp.logical_and(a, b), b)
    assert out.shape == shape and out.dtype == jnp.bool_
    assert bool(jnp.all(out == ref))
    assert out_default.shape == shape and out_default.dtype == jnp.bool_
    assert bool(jnp.all(out_default == ref))

    print("KERNEL_OK")
</pallas_src>

<mosaic_0001>
module attributes {stable_mosaic.version = 11 : i64} {
  func.func @_iand_or_kernel(%arg0: i32, %arg1: memref<2x1024xi8, #tpu.memory_space<vmem>>, %arg2: memref<2x1024xi8, #tpu.memory_space<vmem>>) attributes {dimension_semantics = [#tpu.dimension_semantics<parallel>], iteration_bounds = array<i64: 1>, scalar_prefetch = 0 : i64, scratch_operands = 0 : i64, tpu.core_type = #tpu.core_type<tc>, window_params = [{transform_indices = @transform_0, window_bounds = array<i64: 2, 1024>}, {transform_indices = @transform_1, window_bounds = array<i64: 2, 1024>}]} {
    %c0 = arith.constant 0 : index
    %c0_0 = arith.constant 0 : index
    %0 = vector.load %arg1[%c0, %c0_0] : memref<2x1024xi8, #tpu.memory_space<vmem>>, vector<2x1024xi8>
    %c0_1 = arith.constant 0 : index
    %c0_2 = arith.constant 0 : index
    %1 = vector.load %arg2[%c0_1, %c0_2] : memref<2x1024xi8, #tpu.memory_space<vmem>>, vector<2x1024xi8>
    tpu.vector_store %arg2[%c0_1, %c0_2], %0 {strides = array<i32>} : memref<2x1024xi8, #tpu.memory_space<vmem>>, vector<2x1024xi8>,
    return
  }
  func.func @transform_0(%arg0: i32) -> (i32, i32) {
    %c0_i32 = arith.constant 0 : i32
    %c0_i32_0 = arith.constant 0 : i32
    return %arg0, %c0_i32 : i32, i32
  }
  func.func @transform_1(%arg0: i32) -> (i32, i32) {
    %c0_i32 = arith.constant 0 : i32
    %c0_i32_0 = arith.constant 0 : i32
    return %arg0, %c0_i32 : i32, i32
  }
}

</mosaic_0001>

<bundles_post_ra>
// kernel: simple_iand_module.1
= control target key start
LH: loop header
LB: loop body
LE: loop exit
PB: predicated region body
PF: predicated region fallthrough
CT: control target
= control target key end

     0   :  { %vm9_vm0 = vcmask 1040384   ;;  %vm10_vm1 = vsmask.f32 256  ;;  %vm12_vm2 = vcmask 1041409   ;;  %vm13_vm3 = vsmask.f32 1280  ;;  %s66_s0 = inlined_call_operand.vmem [shape: s8[2,1024], index: 0, kind: input, shape index: {}]   ;;  %s67_s1 = inlined_call_operand.vmem [shape: s8[2,1024], index: 1, kind: output, shape index: {}]  }
   0x1   :  { %vm11_vm4 = vmand %vm9_vm0, %vm10_vm1  ;;  %vm16_vm5 = vcmask 1042434   ;;  %vm17_vm6 = vsmask.f32 2304  ;;  %vm20_vm9 = vcmask 1043459   ;;  %vm21_vm10 = vsmask.f32 3328 }
   0x2   :  { %vm14_vm7 = vmand %vm12_vm2, %vm13_vm3  ;;  %vm24_vm13 = vcmask 1044484   ;;  %vm25_vm14 = vsmask.f32 4352  ;;  %vm28_vm1 = vcmask 1045509   ;;  %vm29_vm2 = vsmask.f32 5376 }
   0x3   :  { %vm15_vm8 = vmor %vm14_vm7, %vm11_vm4  ;;  %vm32_vm7 = vcmask 1046534   ;;  %v8_v0 = vld [vmem:[%s66_s0] sm:$0xff] }
   0x4   :  { %vm18_vm11 = vmand %vm16_vm5, %vm17_vm6  ;;  %vm33_vm5 = vsmask.f32 6400  ;;  %v40_v1 = vld [vmem:[%s67_s1] sm:$0xff] }
   0x5   :  { %vm19_vm12 = vmor %vm18_vm11, %vm15_vm8  ;;  %vm36_vm11 = vcmask 1047559  }
   0x6   :  { %vm22_vm15 = vmand %vm20_vm9, %vm21_vm10  ;;  %vm37_vm9 = vsmask.f32 7424 }
   0x7   :  { %vm23_vm0 = vmor %vm22_vm15, %vm19_vm12 }
   0x8   :  { %vm26_vm3 = vmand %vm24_vm13, %vm25_vm14 }
   0x9   :  { %vm27_vm4 = vmor %vm26_vm3, %vm23_vm0 }
   0xa   :  { %vm30_vm6 = vmand %vm28_vm1, %vm29_vm2 }
   0xb   :  { %vm31_vm8 = vmor %vm30_vm6, %vm27_vm4 }
   0xc   :  { %vm34_vm10 = vmand %vm32_vm7, %vm33_vm5 }
   0xd   :  { %vm35_vm12 = vmor %vm34_vm10, %vm31_vm8 }
   0xe   :  { %vm38_vm15 = vmand %vm36_vm11, %vm37_vm9 }
   0xf   :  { %vm39_vm13 = vmor %vm38_vm15, %vm35_vm12 }
  0x10   :  { %v41_v2 = vsel %vm39_vm13, %v8_v0, %v40_v1 }
  0x11   :  { %42 = vst [vmem:[%s67_s1] sm:$0xff] %v41_v2 }

</bundles_post_ra>
